<compile_context>
chip_gen: v7x
topology: tpu7x:2x2x1
jax: 0.10.0
libtpu: 0.0.40
codegen_flags: <defaults>
</compile_context>

<pallas_src>
import math
from functools import partial

import jax
import jax.numpy as jnp
from jax import lax
from jax.experimental import pallas as pl
from jax.experimental.pallas import tpu as pltpu

_LANES = 128
_SUBLANES = 8
_CHUNK_ROWS = 64          # rows per inner streaming step; (64,128) f32 = 8 vregs


def _tpu_defaults():
    """Return (tensorcores_per_chip, default_tile_rows) from the local device."""
    try:
        dev = jax.devices()[0]
        if dev.platform != "tpu":
            return 1, 4096
        kind = str(getattr(dev, "device_kind", "")).lower()
    except Exception:
        return 1, 4096
    if "v7" in kind:
        # v7x: 2 TensorCores/chip and 3.2 TB/s HBM -> bigger tiles to hide the
        # per-step cost; 64 MiB physical VMEM is the binding limit (stay well
        # under it -- 8192x128 f32 blocks double-buffered are 16 MiB).
        return 2, 8192
    return 1, 4096


def _abs_int_pow(d, n):
    """d ** n for a static positive int n via repeated multiply (VPU only)."""
    result = None
    base = d
    while n:
        if n & 1:
            result = base if result is None else result * base
        n >>= 1
        if n:
            base = base * base
    return result


def _make_elem(p, mode):
    """Per-element transform, combine fn and identity for the reduction mode."""
    if mode == "max":
        return (lambda d: d), jnp.maximum, -jnp.inf
    if mode == "min":
        return (lambda d: d), jnp.minimum, jnp.inf
    # "sum" mode: elem(d) = |d| ** p
    if float(p).is_integer() and int(p) >= 1:
        elem = partial(_abs_int_pow, n=int(p))            # VPU multiplies only
    elif p > 0 and float(2 * p).is_integer():
        k = int(p)                                        # half-integer p

        def elem(d, _k=k):
            s = jnp.sqrt(d)                               # single EUP push
            return s if _k == 0 else _abs_int_pow(d, _k) * s
    else:
        elem = lambda d: d ** jnp.float32(p)              # exp/log pow fallback
    return elem, (lambda a, b: a + b), 0.0


def _make_lp_kernel(elem, combine, identity, tile_rows, chunk_rows,
                    tiles_per_core, n_tiles, n_rows):
    """Kernel factory; all arguments are static Python values / callables."""
    n_chunks = tile_rows // chunk_rows

    def kernel(o_ref, t_ref, acc_ref):
        c = pl.program_id(0)                  # TensorCore split ("parallel")
        i = pl.program_id(1)                  # reduction axis ("arbitrary")
        g = c * tiles_per_core + i            # global row-tile index

        @pl.when(i == 0)
        def _init():
            acc_ref[...] = jnp.full(acc_ref.shape, identity, jnp.float32)

        def tile_partial(masked):
            # Streaming register accumulate: walk the tile in (chunk_rows,128)
            # sub-chunks, combining elementwise into a register-resident
            # (chunk_rows,128) partial (chunk_rows/8 independent vreg chains).
            # Nothing spills to VMEM between the loads and the final fold.
            part = jnp.full((chunk_rows, _LANES), identity, jnp.float32)
            for k in range(n_chunks):
                off = k * chunk_rows
                d = jnp.abs(
                    o_ref[pl.ds(off, chunk_rows), :].astype(jnp.float32)
                    - t_ref[pl.ds(off, chunk_rows), :].astype(jnp.float32))
                v = elem(d)
                if masked:
                    row = (g * tile_rows + off
                           + lax.broadcasted_iota(jnp.int32, v.shape, 0))
                    # Mask BEFORE combining so garbage/OOB rows never poison
                    # the accumulator (they may contain NaN/Inf).
                    v = jnp.where(row < n_rows, v, identity)
                part = combine(part, v)
            # Tree-fold (chunk_rows,128) -> (8,128); stays in registers.
            r = chunk_rows
            while r > _SUBLANES:
                r //= 2
                part = combine(part[:r], part[r:])
            return part

        @pl.when(g < n_tiles - 1)
        def _bulk():
            acc_ref[...] = combine(acc_ref[...], tile_partial(False))

        @pl.when(g >= n_tiles - 1)
        def _tail():
            # Globally-last (possibly partial) tile, plus the fully-masked
            # phantom step on 2-TC chips when the tile count is odd.
            acc_ref[...] = combine(acc_ref[...], tile_partial(True))

    return kernel


def lp_loss_pallas(output, target, p, tile_rows=None):
    """Pallas implementation of LpLoss(p)(output, target). Returns a f32 scalar."""
    batch_size = output.shape[0]
    if batch_size == 0:
        return jnp.asarray(0.0, jnp.float32)

    num_tc, default_tr = _tpu_defaults()
    if tile_rows is None:
        tile_rows = default_tr
    assert tile_rows >= _SUBLANES and (tile_rows & (tile_rows - 1)) == 0, \
        "tile_rows must be a power of two >= 8"

    o = jnp.ravel(output)          # native dtype; cast happens inside the kernel
    t = jnp.ravel(target)
    total = o.size
    if total == 0:
        # Empty feature dims: the difference tensor is empty -> norm is 0.
        return jnp.asarray(0.0, jnp.float32)

    if math.isinf(p):
        mode = "max" if p > 0 else "min"
    else:
        # TODO(synk): p == 0 follows sum(|d|**0) semantics, not torch's count-nonzero L0 norm.
        mode = "sum"
    elem, combine, identity = _make_elem(p, mode)

    itemsize = o.dtype.itemsize
    n_rows = total // _LANES                       # full lane-dense bulk rows
    rem = total - n_rows * _LANES                  # <= 127 ragged tail elements

    # Ragged tail: handled with O(128) plain-JAX work instead of jnp.pad-ing
    # (and re-reading) full copies of both inputs.
    tail_val = None
    if rem:
        dt = jnp.abs(o[n_rows * _LANES:].astype(jnp.float32)
                     - t[n_rows * _LANES:].astype(jnp.float32))
        tv = elem(dt)
        if mode == "sum":
            tail_val = jnp.sum(tv)
        elif mode == "max":
            tail_val = jnp.max(tv)
        else:
            tail_val = jnp.min(tv)

    if n_rows == 0:
        # Fewer than 128 elements total: the JAX epilogue already covers it.
        result = tail_val
    else:
        if rem:
            # TODO(synk): the prefix slice still materializes one copy in XLA
            # (no view across the pallas_call boundary); the common
            # total % 128 == 0 case below is a free reshape.
            o2 = o[: n_rows * _LANES].reshape(n_rows, _LANES)
            t2 = t[: n_rows * _LANES].reshape(n_rows, _LANES)
        else:
            o2 = o.reshape(n_rows, _LANES)
            t2 = t.reshape(n_rows, _LANES)

        # Shrink the row tile (power of two) for small inputs, but never below
        # the native sublane packing of the input dtype (8 f32, 16 bf16, 32 i8).
        min_tr = _SUBLANES * max(1, 4 // max(1, itemsize))
        tr = max(tile_rows, min_tr)
        while tr > min_tr and tr // 2 >= n_rows:
            tr //= 2
        chunk = min(_CHUNK_ROWS, tr)
        n_tiles = pl.cdiv(n_rows, tr)

        # Split the reduction across TensorCores only on multi-TC chips (v7x);
        # on v5e/v6e the split would just be a serial loop + phantom-step waste.
        n_cores = 2 if (num_tc >= 2 and n_tiles >= 2) else 1
        tiles_per_core = pl.cdiv(n_tiles, n_cores)
        needs_clamp = n_cores * tiles_per_core > n_tiles

        kernel = _make_lp_kernel(elem, combine, identity, tr, chunk,
                                 tiles_per_core, n_tiles, n_rows)

        if needs_clamp:
            # Phantom step re-reads the last valid block; kernel fully masks it.
            in_map = lambda c, i: (jnp.minimum(c * tiles_per_core + i,
                                               n_tiles - 1), 0)
        else:
            in_map = lambda c, i: (c * tiles_per_core + i, 0)

        # Two inputs, double-buffered, plus generous slack; capped well under
        # v7x's 64 MiB physical VMEM (v5e/v6e have 128 MiB).
        block_bytes = tr * _LANES * itemsize
        vmem_limit = int(min(2 * 2 * block_bytes + (24 << 20), 48 << 20))

        acc = pl.pallas_call(
            kernel,
            out_shape=jax.ShapeDtypeStruct((n_cores * _SUBLANES, _LANES),
                                           jnp.float32),
            grid_spec=pltpu.PrefetchScalarGridSpec(
                num_scalar_prefetch=0,
                grid=(n_cores, tiles_per_core),
                in_specs=[
                    pl.BlockSpec((tr, _LANES), in_map),
                    pl.BlockSpec((tr, _LANES), in_map),
                ],
                out_specs=pl.BlockSpec((_SUBLANES, _LANES), lambda c, i: (c, 0)),
            ),
            compiler_params=pltpu.CompilerParams(
                dimension_semantics=("parallel", "arbitrary"),
                vmem_limit_bytes=vmem_limit,
            ),
        )(o2, t2)

        # Single cheap cross-lane reduction + scalar glue in plain JAX.
        if mode == "max":
            result = jnp.max(acc)
        elif mode == "min":
            result = jnp.min(acc)
        else:
            result = jnp.sum(acc)
        if tail_val is not None:
            result = combine(result, tail_val)

    if mode == "sum":
        # norm_p(d) ** p == sum(|d| ** p): no pow round-trip needed.
        result = result / batch_size
    return result


def _lp_loss_ref(output, target, p):
    """Pure-JAX reference mirroring the PyTorch module."""
    batch_size = output.shape[0]
    if batch_size == 0:
        return jnp.asarray(0.0, jnp.float32)
    d = jnp.abs(output.astype(jnp.float32) - target.astype(jnp.float32))
    if math.isinf(p):
        return jnp.max(d) if p > 0 else jnp.min(d)
    return jnp.sum(d ** p) / batch_size


if __name__ == "__main__":
    key = jax.random.PRNGKey(0)
    failures = []

    cases = [
        # small (batch, channels, H, W) shapes -- single tile
        ((2, 4, 16, 16), 2, None),
        ((2, 4, 16, 16), 1, None),
        ((2, 4, 16, 16), 3.0, None),
        ((2, 4, 16, 16), 2.5, None),                 # half-integer p -> int-pow * sqrt
        ((2, 4, 16, 16), 1.7, None),                 # generic non-integer p -> pow fallback
        ((2, 4, 16, 16), float("inf"), None),
        ((2, 4, 16, 16), float("-inf"), None),
        # ragged numel (not a multiple of 128) -> plain-JAX tail epilogue
        ((2, 3, 17, 13), 2, None),
        ((2, 3, 17, 13), float("-inf"), None),
        ((2, 3, 5, 3), 2, None),                     # numel < 128 -> pure-JAX path
        # multiple row tiles (masked last block; phantom step on 2-TC chips)
        ((2, 4, 128, 160), 2, 256),
        ((2, 4, 128, 160), float("inf"), 256),
        ((3, 4, 160, 176), 2, 512),
        # auto (large default) tile on a moderately bigger input
        ((4, 8, 64, 64), 2, None),
    ]

    for idx, (shape, p, tr) in enumerate(cases):
        k1, k2 = jax.random.split(jax.random.fold_in(key, idx))
        out_arr = jax.random.normal(k1, shape, dtype=jnp.float32)
        tgt_arr = jax.random.normal(k2, shape, dtype=jnp.float32)
        got = jax.block_until_ready(lp_loss_pallas(out_arr, tgt_arr, p, tile_rows=tr))
        want = jax.block_until_ready(_lp_loss_ref(out_arr, tgt_arr, p))
        if not jnp.allclose(got, want, rtol=1e-4, atol=1e-6):
            failures.append((shape, p, tr, float(got), float(want)))

    # bf16 inputs stay bf16 through HBM; cast happens inside the kernel.
    k1, k2 = jax.random.split(jax.random.fold_in(key, 1000))
    ob = jax.random.normal(k1, (2, 4, 16, 16), dtype=jnp.bfloat16)
    tb = jax.random.normal(k2, (2, 4, 16, 16), dtype=jnp.bfloat16)
    got = jax.block_until_ready(lp_loss_pallas(ob, tb, 2))
    want = jax.block_until_ready(_lp_loss_ref(ob, tb, 2))
    if not jnp.allclose(got, want, rtol=1e-4, atol=1e-6):
        failures.append(("bf16", 2, None, float(got), float(want)))

    # Empty-batch path (pure Python branch, no kernel launch).
    empty = jnp.zeros((0, 4, 16, 16), dtype=jnp.float32)
    zero = jax.block_until_ready(lp_loss_pallas(empty, empty, 2))
    if float(zero) != 0.0:
        failures.append(("empty batch", 2, None, float(zero), 0.0))

    if failures:
        for f in failures:
            print("MISMATCH:", f)
    else:
        print("KERNEL_OK")
</pallas_src>

<mosaic_0001>
module attributes {stable_mosaic.version = 11 : i64} {
  func.func @kernel(%arg0: i32, %arg1: i32, %arg2: memref<16x128xf32, #tpu.memory_space<vmem>>, %arg3: memref<16x128xf32, #tpu.memory_space<vmem>>, %arg4: memref<8x128xf32, #tpu.memory_space<vmem>>) attributes {dimension_semantics = [#tpu.dimension_semantics<parallel>, #tpu.dimension_semantics<arbitrary>], iteration_bounds = array<i64: 1, 1>, scalar_prefetch = 0 : i64, scratch_operands = 0 : i64, tpu.core_type = #tpu.core_type<tc>, window_params = [{transform_indices = @transform_0, window_bounds = array<i64: 16, 128>}, {transform_indices = @transform_1, window_bounds = array<i64: 16, 128>}, {transform_indices = @transform_2, window_bounds = array<i64: 8, 128>}]} {
    %c1_i32 = arith.constant 1 : i32
    %0 = arith.muli %arg0, %c1_i32 : i32
    %1 = arith.addi %0, %arg1 : i32
    %c0_i32 = arith.constant 0 : i32
    %2 = arith.cmpi eq, %arg1, %c0_i32 : i32
    %3 = arith.extui %2 : i1 to i32
    %c0_i32_0 = arith.constant 0 : i32
    %4 = arith.cmpi ne, %3, %c0_i32_0 : i32
    scf.if %4 {
      %cst = arith.constant 0.000000e+00 : f32
      %11 = vector.broadcast %cst : f32 to vector<8x128xf32>
      %c0 = arith.constant 0 : index
      %c0_5 = arith.constant 0 : index
      %12 = vector.load %arg4[%c0, %c0_5] : memref<8x128xf32, #tpu.memory_space<vmem>>, vector<8x128xf32>
      tpu.vector_store %arg4[%c0, %c0_5], %11 {strides = array<i32>} : memref<8x128xf32, #tpu.memory_space<vmem>>, vector<8x128xf32>,
    } else {
    }
    %c0_i32_1 = arith.constant 0 : i32
    %5 = arith.cmpi slt, %1, %c0_i32_1 : i32
    %6 = arith.extui %5 : i1 to i32
    %c0_i32_2 = arith.constant 0 : i32
    %7 = arith.cmpi ne, %6, %c0_i32_2 : i32
    scf.if %7 {
      %c0 = arith.constant 0 : index
      %c0_5 = arith.constant 0 : index
      %11 = vector.load %arg4[%c0, %c0_5] : memref<8x128xf32, #tpu.memory_space<vmem>>, vector<8x128xf32>
      %cst = arith.constant 0.000000e+00 : f32
      %12 = vector.broadcast %cst : f32 to vector<16x128xf32>
      %c0_6 = arith.constant 0 : index
      %c0_7 = arith.constant 0 : index
      %13 = vector.load %arg2[%c0_6, %c0_7] : memref<16x128xf32, #tpu.memory_space<vmem>>, vector<16x128xf32>
      %c0_8 = arith.constant 0 : index
      %c0_9 = arith.constant 0 : index
      %14 = vector.load %arg3[%c0_8, %c0_9] : memref<16x128xf32, #tpu.memory_space<vmem>>, vector<16x128xf32>
      %15 = arith.subf %13, %14 : vector<16x128xf32>
      %16 = math.absf %15 : vector<16x128xf32>
      %17 = arith.mulf %16, %16 : vector<16x128xf32>
      %18 = arith.addf %12, %17 : vector<16x128xf32>
      %19 = vector.extract_strided_slice %18 {offsets = [0, 0], sizes = [8, 128], strides = [1, 1]} : vector<16x128xf32> to vector<8x128xf32>
      %20 = vector.extract_strided_slice %18 {offsets = [8, 0], sizes = [8, 128], strides = [1, 1]} : vector<16x128xf32> to vector<8x128xf32>
      %21 = arith.addf %19, %20 : vector<8x128xf32>
      %22 = arith.addf %11, %21 : vector<8x128xf32>
      %c0_10 = arith.constant 0 : index
      %c0_11 = arith.constant 0 : index
      %23 = vector.load %arg4[%c0_10, %c0_11] : memref<8x128xf32, #tpu.memory_space<vmem>>, vector<8x128xf32>
      tpu.vector_store %arg4[%c0_10, %c0_11], %22 {strides = array<i32>} : memref<8x128xf32, #tpu.memory_space<vmem>>, vector<8x128xf32>,
    } else {
    }
    %c0_i32_3 = arith.constant 0 : i32
    %8 = arith.cmpi sge, %1, %c0_i32_3 : i32
    %9 = arith.extui %8 : i1 to i32
    %c0_i32_4 = arith.constant 0 : i32
    %10 = arith.cmpi ne, %9, %c0_i32_4 : i32
    scf.if %10 {
      %c0 = arith.constant 0 : index
      %c0_5 = arith.constant 0 : index
      %11 = vector.load %arg4[%c0, %c0_5] : memref<8x128xf32, #tpu.memory_space<vmem>>, vector<8x128xf32>
      %cst = arith.constant 0.000000e+00 : f32
      %12 = vector.broadcast %cst : f32 to vector<16x128xf32>
      %c0_6 = arith.constant 0 : index
      %c0_7 = arith.constant 0 : index
      %13 = vector.load %arg2[%c0_6, %c0_7] : memref<16x128xf32, #tpu.memory_space<vmem>>, vector<16x128xf32>
      %c0_8 = arith.constant 0 : index
      %c0_9 = arith.constant 0 : index
      %14 = vector.load %arg3[%c0_8, %c0_9] : memref<16x128xf32, #tpu.memory_space<vmem>>, vector<16x128xf32>
      %15 = arith.subf %13, %14 : vector<16x128xf32>
      %16 = math.absf %15 : vector<16x128xf32>
      %17 = arith.mulf %16, %16 : vector<16x128xf32>
      %c16_i32 = arith.constant 16 : i32
      %18 = arith.muli %1, %c16_i32 : i32
      %c0_i32_10 = arith.constant 0 : i32
      %19 = arith.addi %18, %c0_i32_10 : i32
      %20 = tpu.iota {dimensions = array<i32: 0>} : vector<16x128xi32>
      %21 = vector.broadcast %19 : i32 to vector<16x128xi32>
      %22 = arith.addi %21, %20 : vector<16x128xi32>
      %c16_i32_11 = arith.constant 16 : i32
      %23 = vector.broadcast %c16_i32_11 : i32 to vector<16x128xi32>
      %24 = arith.cmpi slt, %22, %23 : vector<16x128xi32>
      %cst_12 = arith.constant 0.000000e+00 : f32
      %25 = vector.broadcast %cst_12 : f32 to vector<16x128xf32>
      %26 = arith.select %24, %17, %25 : vector<16x128xi1>, vector<16x128xf32>
      %27 = arith.addf %12, %26 : vector<16x128xf32>
      %28 = vector.extract_strided_slice %27 {offsets = [0, 0], sizes = [8, 128], strides = [1, 1]} : vector<16x128xf32> to vector<8x128xf32>
      %29 = vector.extract_strided_slice %27 {offsets = [8, 0], sizes = [8, 128], strides = [1, 1]} : vector<16x128xf32> to vector<8x128xf32>
      %30 = arith.addf %28, %29 : vector<8x128xf32>
      %31 = arith.addf %11, %30 : vector<8x128xf32>
      %c0_13 = arith.constant 0 : index
      %c0_14 = arith.constant 0 : index
      %32 = vector.load %arg4[%c0_13, %c0_14] : memref<8x128xf32, #tpu.memory_space<vmem>>, vector<8x128xf32>
      tpu.vector_store %arg4[%c0_13, %c0_14], %31 {strides = array<i32>} : memref<8x128xf32, #tpu.memory_space<vmem>>, vector<8x128xf32>,
    } else {
    }
    return
  }
  func.func @transform_0(%arg0: i32, %arg1: i32) -> (i32, i32) {
    %c1_i32 = arith.constant 1 : i32
    %0 = arith.muli %arg0, %c1_i32 : i32
    %1 = arith.addi %0, %arg1 : i32
    %c0_i32 = arith.constant 0 : i32
    %c0_i32_0 = arith.constant 0 : i32
    return %1, %c0_i32 : i32, i32
  }
  func.func @transform_1(%arg0: i32, %arg1: i32) -> (i32, i32) {
    %c1_i32 = arith.constant 1 : i32
    %0 = arith.muli %arg0, %c1_i32 : i32
    %1 = arith.addi %0, %arg1 : i32
    %c0_i32 = arith.constant 0 : i32
    %c0_i32_0 = arith.constant 0 : i32
    return %1, %c0_i32 : i32, i32
  }
  func.func @transform_2(%arg0: i32, %arg1: i32) -> (i32, i32) {
    %c0_i32 = arith.constant 0 : i32
    %c0_i32_0 = arith.constant 0 : i32
    return %arg0, %c0_i32 : i32, i32
  }
}

</mosaic_0001>

<bundles_post_ra>
// kernel: tpu_custom_call.1
= control target key start
LH: loop header
LB: loop body
LE: loop exit
PB: predicated region body
PF: predicated region fallthrough
CT: control target
= control target key end

     0   :  { %7 = vsyncpa [#allocation3], 0  ;;  %s259_s0 = inlined_call_operand.hbm [shape: f32[16,128], index: 0, kind: input, shape index: {}]   ;;  %s260_s1 = inlined_call_operand.hbm [shape: f32[16,128], index: 1, kind: input, shape index: {}]   ;;  %s261_s2 = inlined_call_operand.hbm [shape: f32[8,128], index: 2, kind: output, shape index: {}]  }
   0x1   :  { %8 = vsyncpa [#allocation6], 0 }
   0x2   :  { %9 = vsyncpa [#allocation4], 0  ;;  %s203_s9 = smov [#allocation2]   ;;  %s131_s13 = scalar_lea.hbm %s259_s0, 256 }
   0x3   :  { %s19_s10 = sshll.u32 %s203_s9, 4  ;;  %p132_p0 = scmp.ne.s32.totalorder %s259_s0, %s131_s13  ;;  %s20_s10 = int_to_ptr.vmem [resolvable:$true] %s19_s10 }
   0x4   :  { %p135_p1 = scmp.lt.u32.totalorder %s131_s13, %s259_s0 }
   0x6   :  { %p137_p2 = pnand %p135_p1, %p132_p0 }
   0x8   :  { %140 = shalt.err (!%p137_p2)
}
   0x9   :  { %s141_s18 = scalar_lea.vmem %s20_s10, 256  ;;  %p146_p4 = scmp.lt.s32.totalorder %s20_s10, %s20_s10 }
   0xa   :  { %p142_p3 = scmp.ne.s32.totalorder %s20_s10, %s141_s18  ;;  %p147_p5 = scmp.lt.s32.totalorder %s141_s18, %s141_s18 }
   0xc   :  { %p148_p6 = por %p147_p5, %p146_p4 }
   0xe   :  { %p149_p7 = pnand %p148_p6, %p142_p3 }
  0x10   :  { %152 = shalt.err (!%p149_p7)
}
  0x11   :  { %s204_s19 = smov 128   ;;  %s205_s20 = smov 8  }
  0x12   :  { %25 = dma.hbm_to_vmem [thread:$0]  %s259_s0, 256, %s20_s10, [#allocation3], %s204_s19, %s204_s19, %s205_s20  }
  0x13   :  { %s206_s23 = smov [#allocation5]   ;;  %s153_s27 = scalar_lea.hbm %s260_s1, 256 }
  0x14   :  { %s35_s24 = sshll.u32 %s206_s23, 4  ;;  %p154_p8 = scmp.ne.s32.totalorder %s260_s1, %s153_s27  ;;  %s36_s24 = int_to_ptr.vmem [resolvable:$true] %s35_s24 }
  0x15   :  { %p157_p9 = scmp.lt.u32.totalorder %s153_s27, %s260_s1 }
  0x17   :  { %p159_p10 = pnand %p157_p9, %p154_p8 }
  0x19   :  { %162 = shalt.err (!%p159_p10)
}
  0x1a   :  { %s163_s4 = scalar_lea.vmem %s36_s24, 256  ;;  %p168_p12 = scmp.lt.s32.totalorder %s36_s24, %s36_s24 }
  0x1b   :  { %p164_p11 = scmp.ne.s32.totalorder %s36_s24, %s163_s4  ;;  %p169_p13 = scmp.lt.s32.totalorder %s163_s4, %s163_s4 }
  0x1d   :  { %p170_p0 = por %p169_p13, %p168_p12 }
  0x1f   :  { %p171_p1 = pnand %p170_p0, %p164_p11 }
  0x21   :  { %174 = shalt.err (!%p171_p1)
}
  0x22   :  { %41 = dma.hbm_to_vmem [thread:$0]  %s260_s1, 256, %s36_s24, [#allocation6], %s204_s19, %s204_s19, %s205_s20  }
  0x23   :  { %197 = dma.done.wait [#allocation3], 256  }
  0x24   :  { %198 = vsyncadd [#allocation3], 4294967040 }
  0x25   :  { %199 = dma.done.wait [#allocation6], 256  }
  0x26   :  { %200 = vsyncadd [#allocation6], 4294967040  ;;  %v83_v0 = vld [vmem:[#allocation2] sm:$0xff]  ;;  %v84_v1 = vld [vmem:[#allocation2 + $0x8] sm:$0xff]  ;;  %s207_s6 = smov [#allocation7]  }
  0x27   :  { %v85_v2 = vld [vmem:[#allocation5] sm:$0xff]  ;;  %v86_v3 = vld [vmem:[#allocation5 + $0x8] sm:$0xff]  ;;  %s115_s7 = sshll.u32 %s207_s6, 4  ;;  %s116_s7 = int_to_ptr.vmem [resolvable:$true] %s115_s7 }
  0x28   :  { %v87_v4 = vsub.f32 %v83_v0, %v85_v2  ;;  %v88_v5 = vsub.f32 %v84_v1, %v86_v3  ;;  %s175_s1 = scalar_lea.vmem %s116_s7, 128  ;;  %p180_p3 = scmp.lt.s32.totalorder %s116_s7, %s116_s7 }
  0x29   :  { %p176_p2 = scmp.ne.s32.totalorder %s116_s7, %s175_s1  ;;  %p181_p4 = scmp.lt.s32.totalorder %s175_s1, %s175_s1 }
  0x2a   :  { %v89_v6 = vand.u32 2147483647, %v87_v4  ;;  %v90_v7 = vand.u32 2147483647, %v88_v5 }
  0x2b   :  { %p182_p5 = por %p181_p4, %p180_p3 }
  0x2c   :  { %v91_v8 = vmul.f32 %v89_v6, %v89_v6  ;;  %v92_v9 = vmul.f32 %v90_v7, %v90_v7 }
  0x2d   :  { %p183_p6 = pnand %p182_p5, %p176_p2 }
  0x2e   :  { %v106_v10 = vadd.f32 %v92_v9, %v91_v8 }
  0x30   :  { %108 = vst [vmem:[#allocation7] sm:$0xff] %v106_v10 }
  0x31   :  { %186 = shalt.err (!%p183_p6)
}
  0x32   :  { %s187_s10 = scalar_lea.hbm %s261_s2, 128 }
  0x33   :  { %p188_p7 = scmp.ne.s32.totalorder %s261_s2, %s187_s10  ;;  %p191_p8 = scmp.lt.u32.totalorder %s187_s10, %s261_s2 }
  0x35   :  { %p193_p9 = pnand %p191_p8, %p188_p7 }
  0x37   :  { %196 = shalt.err (!%p193_p9)
}
  0x38   :  { %118 = dma.vmem_to_hbm [thread:$0]  %s116_s7, 128, %s261_s2, [#allocation4]  }
  0x39   :  { %201 = dma.done.wait [#allocation4], 128  }
  0x3a   :  { %202 = vsyncadd [#allocation4], 4294967168 }
  0x3b   :  { %122 = vsyncpa [#allocation3], 1 }
  0x3c   :  { %123 = vsyncpa [#allocation6], 1 }
  0x3d   :  { %124 = vsyncpa [#allocation4], 1 }

</bundles_post_ra>
